<compile_context>
chip_gen: v7x
topology: tpu7x:2x2x1
jax: 0.10.0
libtpu: 0.0.40
codegen_flags: <defaults>
</compile_context>

<pallas_src>
import jax
import jax.numpy as jnp
from jax.experimental import pallas as pl
from jax.experimental.pallas import tpu as pltpu


def _round_up(x, m):
    return ((x + m - 1) // m) * m


def mlp_kernel(x_ref, w1_ref, b1_ref, w2_ref, b2_ref, o_ref):
    # x arrives f32 straight from HBM; cast in-kernel (cheap VPU work hidden
    # under the DMA / MXU pipeline) so the wrapper never re-materializes x.
    x = x_ref[...].astype(jnp.bfloat16)
    # layer1: [TB, in](bf16) @ [in, Hp](bf16) -> f32 accumulation on the MXU
    h = jnp.dot(x, w1_ref[...], preferred_element_type=jnp.float32)
    h = h + b1_ref[...]                      # bias f32, broadcast over rows
    # sigmoid via tanh: sigmoid(z) = 0.5 * (tanh(z/2) + 1)
    # -> one EUP op + cheap VALU mul/add (vs exp + reciprocal = two EUP pushes)
    h = 0.5 * (jnp.tanh(0.5 * h) + 1.0)
    # layer2: [TB, Hp](bf16) @ [Hp, Op](bf16) -> f32 accumulation
    out = jnp.dot(h.astype(jnp.bfloat16), w2_ref[...],
                  preferred_element_type=jnp.float32)
    out = out + b2_ref[...]
    # bf16, lane-dense (Op is a multiple of 128) writeback -> half the bytes.
    o_ref[...] = out.astype(o_ref.dtype)


def prepare_params(w1, b1, w2, b2, *, param_dtype=jnp.bfloat16):
    """One-time layout prep (do NOT call per forward step).

    w1: [hidden, in], b1: [hidden], w2: [out, hidden], b2: [out]  (PyTorch layout)
    Returns weights as [in, Hp] / [Hp, Op] (lane-padded to 128, bf16) and biases
    as [1, Hp] / [1, Op] (f32), plus the true output width for post-slicing.

    Invariant: padded rows of w2_t and padded entries of b1 stay exactly zero
    so the sigmoid(0)=0.5 contributions from padded hidden units cancel.
    """
    hidden, in_dim = w1.shape
    out_dim = w2.shape[0]
    Hp = _round_up(hidden, 128)
    Op = _round_up(out_dim, 128)

    w1_t = jnp.zeros((in_dim, Hp), param_dtype).at[:, :hidden].set(
        w1.T.astype(param_dtype))
    b1_p = jnp.zeros((1, Hp), jnp.float32).at[:, :hidden].set(
        b1.astype(jnp.float32))
    w2_t = jnp.zeros((Hp, Op), param_dtype).at[:hidden, :out_dim].set(
        w2.T.astype(param_dtype))
    b2_p = jnp.zeros((1, Op), jnp.float32).at[:, :out_dim].set(
        b2.astype(jnp.float32))
    return (w1_t, b1_p, w2_t, b2_p), out_dim


def _pick_batch_tile(B):
    """Batch tile selection.

    - tiny/medium B: one tile, rounded to 16 rows (bf16 sublane packing).
    - B >= 512: at least 2 tiles (v7x has 2 TensorCores; the parallel grid
      axis is sharded across them), tiles of 256..1024 rows (>=512-row tiles
      reach ~85% of HBM roofline; per-grid-step overhead ~0.35 us).
    """
    if B < 512:
        return _round_up(B, 16)
    return min(1024, _round_up(pl.cdiv(B, 2), 256))


def mlp_forward(x, prepared, out_dim):
    """x: [B, in] float32 (kept f32; cast to bf16 happens inside the kernel).

    Returns [B, out_dim] bf16 (upcast outside if the consumer needs f32).
    """
    w1_t, b1_p, w2_t, b2_p = prepared
    B, in_dim = x.shape
    Hp = w1_t.shape[1]
    Op = w2_t.shape[1]

    TB = _pick_batch_tile(B)
    B_pad = _round_up(B, TB)

    x_in = x
    if B_pad != B:
        # Row padding only (no dtype change). Padded rows produce bias-only
        # garbage that is sliced off below.
        x_in = jnp.zeros((B_pad, in_dim), x.dtype).at[:B].set(x)

    out = pl.pallas_call(
        mlp_kernel,
        out_shape=jax.ShapeDtypeStruct((B_pad, Op), jnp.bfloat16),
        grid_spec=pltpu.PrefetchScalarGridSpec(
            num_scalar_prefetch=0,
            grid=(B_pad // TB,),
            in_specs=[
                pl.BlockSpec((TB, in_dim), lambda i: (i, 0)),   # x streams f32
                pl.BlockSpec((in_dim, Hp), lambda i: (0, 0)),   # VMEM-resident
                pl.BlockSpec((1, Hp), lambda i: (0, 0)),
                pl.BlockSpec((Hp, Op), lambda i: (0, 0)),       # VMEM-resident
                pl.BlockSpec((1, Op), lambda i: (0, 0)),
            ],
            out_specs=pl.BlockSpec((TB, Op), lambda i: (i, 0)),
        ),
        compiler_params=pltpu.CompilerParams(
            dimension_semantics=("parallel",)),
    )(x_in, w1_t, b1_p, w2_t, b2_p)

    # Slice away batch and lane padding outside the kernel.
    return out[:B, :out_dim]


def init_params(key, input_size, hidden_size, output_size):
    """Deterministic init mimicking PyTorch nn.Linear (uniform +/- 1/sqrt(fan_in))."""
    k1, k2, k3, k4 = jax.random.split(key, 4)
    lim1 = 1.0 / (input_size ** 0.5)
    lim2 = 1.0 / (hidden_size ** 0.5)
    w1 = jax.random.uniform(k1, (hidden_size, input_size), jnp.float32, -lim1, lim1)
    b1 = jax.random.uniform(k2, (hidden_size,), jnp.float32, -lim1, lim1)
    w2 = jax.random.uniform(k3, (output_size, hidden_size), jnp.float32, -lim2, lim2)
    b2 = jax.random.uniform(k4, (output_size,), jnp.float32, -lim2, lim2)
    return w1, b1, w2, b2


if __name__ == "__main__":
    key = jax.random.PRNGKey(0)
    kx, kp = jax.random.split(key)

    input_size, hidden_size, output_size = 28 * 28, 100, 10
    batch = 8

    x = jax.random.normal(kx, (batch, input_size), dtype=jnp.float32)
    w1, b1, w2, b2 = init_params(kp, input_size, hidden_size, output_size)

    # Layout prep happens ONCE, outside the forward path.
    prepared, out_dim = prepare_params(w1, b1, w2, b2)

    out = mlp_forward(x, prepared, out_dim)
    out = jax.block_until_ready(out)

    # Reference in plain f32 JAX (same semantics as the PyTorch forward).
    h_ref = jax.nn.sigmoid(x @ w1.T + b1)
    out_ref = h_ref @ w2.T + b2
    assert out.shape == (batch, output_size)
    # Looser tolerance: bf16 weights/activations + bf16 output writeback.
    assert jnp.allclose(out.astype(jnp.float32), out_ref, atol=5e-2, rtol=5e-2)

    print("KERNEL_OK")
</pallas_src>

<mosaic_0001>
module attributes {stable_mosaic.version = 11 : i64} {
  func.func @mlp_kernel(%arg0: i32, %arg1: memref<16x784xf32, #tpu.memory_space<vmem>>, %arg2: memref<784x128xbf16, #tpu.memory_space<vmem>>, %arg3: memref<1x128xf32, #tpu.memory_space<vmem>>, %arg4: memref<128x128xbf16, #tpu.memory_space<vmem>>, %arg5: memref<1x128xf32, #tpu.memory_space<vmem>>, %arg6: memref<16x128xbf16, #tpu.memory_space<vmem>>) attributes {dimension_semantics = [#tpu.dimension_semantics<parallel>], iteration_bounds = array<i64: 1>, scalar_prefetch = 0 : i64, scratch_operands = 0 : i64, tpu.core_type = #tpu.core_type<tc>, window_params = [{transform_indices = @transform_0, window_bounds = array<i64: 16, 784>}, {pipeline_mode = #tpu.pipeline_mode<synchronous>, transform_indices = @transform_1, window_bounds = array<i64: 784, 128>}, {pipeline_mode = #tpu.pipeline_mode<synchronous>, transform_indices = @transform_2, window_bounds = array<i64: 1, 128>}, {pipeline_mode = #tpu.pipeline_mode<synchronous>, transform_indices = @transform_3, window_bounds = array<i64: 128, 128>}, {pipeline_mode = #tpu.pipeline_mode<synchronous>, transform_indices = @transform_4, window_bounds = array<i64: 1, 128>}, {transform_indices = @transform_5, window_bounds = array<i64: 16, 128>}]} {
    %c0 = arith.constant 0 : index
    %c0_0 = arith.constant 0 : index
    %0 = vector.load %arg1[%c0, %c0_0] : memref<16x784xf32, #tpu.memory_space<vmem>>, vector<16x784xf32>
    %1 = arith.truncf %0 : vector<16x784xf32> to vector<16x784xbf16>
    %c0_1 = arith.constant 0 : index
    %c0_2 = arith.constant 0 : index
    %2 = vector.load %arg2[%c0_1, %c0_2] : memref<784x128xbf16, #tpu.memory_space<vmem>>, vector<784x128xbf16>
    %cst = arith.constant dense<0.000000e+00> : vector<16x128xf32>
    %3 = tpu.matmul %1, %2, %cst {dimension_numbers = #tpu.dot_dimension_numbers<[1], [0], [0], [1], [0, 0, 1, 1], [], []>} : vector<16x784xbf16>, vector<784x128xbf16>, vector<16x128xf32> -> vector<16x128xf32>
    %c0_3 = arith.constant 0 : index
    %c0_4 = arith.constant 0 : index
    %4 = vector.load %arg3[%c0_3, %c0_4] : memref<1x128xf32, #tpu.memory_space<vmem>>, vector<1x128xf32>
    %5 = vector.broadcast %4 : vector<1x128xf32> to vector<16x128xf32>
    %6 = arith.addf %3, %5 : vector<16x128xf32>
    %cst_5 = arith.constant 5.000000e-01 : f32
    %7 = vector.broadcast %cst_5 : f32 to vector<16x128xf32>
    %8 = arith.mulf %7, %6 : vector<16x128xf32>
    %9 = math.tanh %8 : vector<16x128xf32>
    %cst_6 = arith.constant 1.000000e+00 : f32
    %10 = vector.broadcast %cst_6 : f32 to vector<16x128xf32>
    %11 = arith.addf %9, %10 : vector<16x128xf32>
    %cst_7 = arith.constant 5.000000e-01 : f32
    %12 = vector.broadcast %cst_7 : f32 to vector<16x128xf32>
    %13 = arith.mulf %12, %11 : vector<16x128xf32>
    %14 = arith.truncf %13 : vector<16x128xf32> to vector<16x128xbf16>
    %c0_8 = arith.constant 0 : index
    %c0_9 = arith.constant 0 : index
    %15 = vector.load %arg4[%c0_8, %c0_9] : memref<128x128xbf16, #tpu.memory_space<vmem>>, vector<128x128xbf16>
    %cst_10 = arith.constant dense<0.000000e+00> : vector<16x128xf32>
    %16 = tpu.matmul %14, %15, %cst_10 {dimension_numbers = #tpu.dot_dimension_numbers<[1], [0], [0], [1], [0, 0, 1, 1], [], []>} : vector<16x128xbf16>, vector<128x128xbf16>, vector<16x128xf32> -> vector<16x128xf32>
    %c0_11 = arith.constant 0 : index
    %c0_12 = arith.constant 0 : index
    %17 = vector.load %arg5[%c0_11, %c0_12] : memref<1x128xf32, #tpu.memory_space<vmem>>, vector<1x128xf32>
    %18 = vector.broadcast %17 : vector<1x128xf32> to vector<16x128xf32>
    %19 = arith.addf %16, %18 : vector<16x128xf32>
    %20 = arith.truncf %19 : vector<16x128xf32> to vector<16x128xbf16>
    %c0_13 = arith.constant 0 : index
    %c0_14 = arith.constant 0 : index
    %21 = vector.load %arg6[%c0_13, %c0_14] : memref<16x128xbf16, #tpu.memory_space<vmem>>, vector<16x128xbf16>
    tpu.vector_store %arg6[%c0_13, %c0_14], %20 {strides = array<i32>} : memref<16x128xbf16, #tpu.memory_space<vmem>>, vector<16x128xbf16>,
    return
  }
  func.func @transform_0(%arg0: i32) -> (i32, i32) {
    %c0_i32 = arith.constant 0 : i32
    %c0_i32_0 = arith.constant 0 : i32
    return %arg0, %c0_i32 : i32, i32
  }
  func.func @transform_1(%arg0: i32) -> (i32, i32) {
    %c0_i32 = arith.constant 0 : i32
    %c0_i32_0 = arith.constant 0 : i32
    %c0_i32_1 = arith.constant 0 : i32
    return %c0_i32, %c0_i32_0 : i32, i32
  }
  func.func @transform_2(%arg0: i32) -> (i32, i32) {
    %c0_i32 = arith.constant 0 : i32
    %c0_i32_0 = arith.constant 0 : i32
    %c0_i32_1 = arith.constant 0 : i32
    return %c0_i32, %c0_i32_0 : i32, i32
  }
  func.func @transform_3(%arg0: i32) -> (i32, i32) {
    %c0_i32 = arith.constant 0 : i32
    %c0_i32_0 = arith.constant 0 : i32
    %c0_i32_1 = arith.constant 0 : i32
    return %c0_i32, %c0_i32_0 : i32, i32
  }
  func.func @transform_4(%arg0: i32) -> (i32, i32) {
    %c0_i32 = arith.constant 0 : i32
    %c0_i32_0 = arith.constant 0 : i32
    %c0_i32_1 = arith.constant 0 : i32
    return %c0_i32, %c0_i32_0 : i32, i32
  }
  func.func @transform_5(%arg0: i32) -> (i32, i32) {
    %c0_i32 = arith.constant 0 : i32
    %c0_i32_0 = arith.constant 0 : i32
    return %arg0, %c0_i32 : i32, i32
  }
}

</mosaic_0001>

<bundles_post_ra>
// kernel: tpu_custom_call.1
= control target key start
LH: loop header
LB: loop body
LE: loop exit
PB: predicated region body
PF: predicated region fallthrough
CT: control target
= control target key end

     0   :  { %10 = vsyncpa [#allocation3], 0  ;;  %s1253_s0 = inlined_call_operand.hbm [shape: f32[16,784], index: 0, kind: input, shape index: {}]   ;;  %s1254_s1 = inlined_call_operand.hbm [shape: bf16[784,128], index: 1, kind: input, shape index: {}]   ;;  %s1255_s2 = inlined_call_operand.vmem [shape: f32[1,128], index: 2, kind: input, shape index: {}]   ;;  %s1256_s3 = inlined_call_operand.hbm [shape: bf16[128,128], index: 3, kind: input, shape index: {}]   ;;  %s1257_s4 = inlined_call_operand.vmem [shape: f32[1,128], index: 4, kind: input, shape index: {}]   ;;  %s1258_s5 = inlined_call_operand.hbm [shape: bf16[16,128], index: 5, kind: output, shape index: {}]  }
   0x1   :  { %11 = vsyncpa [#allocation6], 0 }
   0x2   :  { %12 = vsyncpa [#allocation4], 0  ;;  %s1137_s18 = smov [#allocation5]   ;;  %s1043_s22 = scalar_lea.hbm %s1254_s1, 6272 }
   0x3   :  { %s30_s19 = sshll.u32 %s1137_s18, 4  ;;  %p1044_p0 = scmp.ne.s32.totalorder %s1254_s1, %s1043_s22  ;;  %s31_s19 = int_to_ptr.vmem [resolvable:$true] %s30_s19 }
   0x4   :  { %p1047_p1 = scmp.lt.u32.totalorder %s1043_s22, %s1254_s1 }
   0x6   :  { %p1049_p2 = pnand %p1047_p1, %p1044_p0 }
   0x8   :  { %1052 = shalt.err (!%p1049_p2)
}
   0x9   :  { %s1053_s27 = scalar_lea.vmem %s31_s19, 6272  ;;  %p1058_p4 = scmp.lt.s32.totalorder %s31_s19, %s31_s19 }
   0xa   :  { %p1054_p3 = scmp.ne.s32.totalorder %s31_s19, %s1053_s27  ;;  %p1059_p5 = scmp.lt.s32.totalorder %s1053_s27, %s1053_s27 }
   0xc   :  { %p1060_p6 = por %p1059_p5, %p1058_p4 }
   0xe   :  { %p1061_p7 = pnand %p1060_p6, %p1054_p3 }
  0x10   :  { %1064 = shalt.err (!%p1061_p7)
}
  0x11   :  { %s1138_s28 = smov 64   ;;  %s1139_s29 = smov 4  }
  0x12   :  { %36 = dma.hbm_to_vmem [thread:$0]  %s1254_s1, 6272, %s31_s19, [#allocation6], %s1138_s28, %s1138_s28, %s1139_s29  }
  0x13   :  { %s1140_s7 = smov [#allocation2]   ;;  %s1065_s11 = scalar_lea.hbm %s1253_s0, 1792 }
  0x14   :  { %s18_s8 = sshll.u32 %s1140_s7, 4  ;;  %p1066_p8 = scmp.ne.s32.totalorder %s1253_s0, %s1065_s11  ;;  %s19_s8 = int_to_ptr.vmem [resolvable:$true] %s18_s8 }
  0x15   :  { %p1069_p9 = scmp.lt.u32.totalorder %s1065_s11, %s1253_s0 }
  0x17   :  { %p1071_p10 = pnand %p1069_p9, %p1066_p8 }
  0x19   :  { %1074 = shalt.err (!%p1071_p10)
}
  0x1a   :  { %s1075_s16 = scalar_lea.vmem %s19_s8, 1792  ;;  %p1080_p12 = scmp.lt.s32.totalorder %s19_s8, %s19_s8 }
  0x1b   :  { %p1076_p11 = scmp.ne.s32.totalorder %s19_s8, %s1075_s16  ;;  %p1081_p13 = scmp.lt.s32.totalorder %s1075_s16, %s1075_s16 }
  0x1d   :  { %p1082_p0 = por %p1081_p13, %p1080_p12 }
  0x1f   :  { %p1083_p1 = pnand %p1082_p0, %p1076_p11 }
  0x21   :  { %1086 = shalt.err (!%p1083_p1)
}
  0x22   :  { %s1141_s1 = smov 896   ;;  %s1142_s17 = smov 56  }
  0x23   :  { %24 = dma.hbm_to_vmem [thread:$0]  %s1253_s0, 1792, %s19_s8, [#allocation3], %s1141_s1, %s1141_s1, %s1142_s17  }
  0x24   :  { %s1143_s20 = smov [#allocation7]   ;;  %s1087_s24 = scalar_lea.hbm %s1256_s3, 1024 }
  0x25   :  { %s44_s21 = sshll.u32 %s1143_s20, 4  ;;  %p1088_p2 = scmp.ne.s32.totalorder %s1256_s3, %s1087_s24  ;;  %s45_s21 = int_to_ptr.vmem [resolvable:$true] %s44_s21 }
  0x26   :  { %p1091_p3 = scmp.lt.u32.totalorder %s1087_s24, %s1256_s3 }
  0x28   :  { %p1093_p4 = pnand %p1091_p3, %p1088_p2 }
  0x2a   :  { %1096 = shalt.err (!%p1093_p4)
}
  0x2b   :  { %s1097_s6 = scalar_lea.vmem %s45_s21, 1024  ;;  %p1102_p6 = scmp.lt.s32.totalorder %s45_s21, %s45_s21 }
  0x2c   :  { %p1098_p5 = scmp.ne.s32.totalorder %s45_s21, %s1097_s6  ;;  %p1103_p7 = scmp.lt.s32.totalorder %s1097_s6, %s1097_s6 }
  0x2e   :  { %p1104_p8 = por %p1103_p7, %p1102_p6 }
  0x30   :  { %p1105_p9 = pnand %p1104_p8, %p1098_p5 }
  0x32   :  { %1108 = shalt.err (!%p1105_p9)
}
  0x33   :  { %50 = dma.hbm_to_vmem [thread:$0]  %s1256_s3, 1024, %s45_s21, [#allocation6], %s1138_s28, %s1138_s28, %s1139_s29  }
  0x34   :  { %1131 = dma.done.wait [#allocation3], 1792  }
  0x35   :  { %1132 = vsyncadd [#allocation3], 4294965504 }
  0x36   :  { %1133 = dma.done.wait [#allocation6], 7296  }
  0x37   :  { %1134 = vsyncadd [#allocation6], 4294960000  ;;  %v982_v0 = vld [vmem:[#allocation5 + $0x40] sm:$0xff]   ;;  %v986_v4 = vld [vmem:[#allocation5 + $0x48] sm:$0xff]   ;;  %v1144_v43 = vmov 0.0   ;;  %vm1145_vm0 = vmmov 0  }
  0x38   :  { %v983_v1 = vld [vmem:[#allocation5] sm:$0xff]   ;;  %869 = vmatprep.subr.bf16.mxu0 %v982_v0  ;;  %v987_v5 = vld [vmem:[#allocation5 + $0x8] sm:$0xff]   ;;  %v990_v8 = vld [vmem:[#allocation5 + $0x50] sm:$0xff]   ;;  %vm483_vm1 = vcmask 130048   ;;  %s1146_s10 = smov [#allocation8]  }
  0x39   :  { %v984_v2 = vld [vmem:[#allocation5 + $0xc0] sm:$0xff]   ;;  %870 = vmatpush3.bf16.msra.mxu0 %v983_v1  ;;  %v988_v6 = vld [vmem:[#allocation5 + $0xc8] sm:$0xff]   ;;  %v991_v9 = vld [vmem:[#allocation5 + $0x10] sm:$0xff]   ;;  %s787_s11 = sshll.u32 %s1146_s10, 4  ;;  %s788_s11 = int_to_ptr.vmem [resolvable:$true] %s787_s11 }
  0x3a   :  { %v985_v3 = vld [vmem:[#allocation5 + $0x80] sm:$0xff]   ;;  %891 = vmatprep.subr.bf16.mxu1 %v984_v2  ;;  %871 = vmatprep.subr.bf16.mxu0 %v986_v4  ;;  %v989_v7 = vld [vmem:[#allocation5 + $0x88] sm:$0xff]   ;;  %v992_v10 = vld [vmem:[#allocation5 + $0xd0] sm:$0xff]   ;;  %s1109_s12 = scalar_lea.vmem %s788_s11, 128  ;;  %p1114_p11 = scmp.lt.s32.totalorder %s788_s11, %s788_s11 }
  0x3b   :  { %892 = vmatpush3.bf16.msra.mxu1 %v985_v3  ;;  %v993_v11 = vld [vmem:[#allocation5 + $0x90] sm:$0xff]   ;;  %v994_v12 = vld [vmem:[#allocation5 + $0x58] sm:$0xff]   ;;  %v998_v16 = vld [vmem:[#allocation5 + $0x60] sm:$0xff]   ;;  %p1110_p10 = scmp.ne.s32.totalorder %s788_s11, %s1109_s12  ;;  %p1115_p12 = scmp.lt.s32.totalorder %s1109_s12, %s1109_s12 }
  0x3c   :  { %893 = vmatprep.subr.bf16.mxu1 %v988_v6  ;;  %v995_v13 = vld [vmem:[#allocation5 + $0x18] sm:$0xff]   ;;  %v999_v17 = vld [vmem:[#allocation5 + $0x20] sm:$0xff]   ;;  %v1002_v20 = vld [vmem:[#allocation5 + $0x68] sm:$0xff]  }
  0x3d   :  { %872 = vmatpush3.bf16.msra.mxu0 %v987_v5  ;;  %v996_v14 = vld [vmem:[#allocation5 + $0xd8] sm:$0xff]   ;;  %v1000_v18 = vld [vmem:[#allocation5 + $0xe0] sm:$0xff]   ;;  %v1003_v21 = vld [vmem:[#allocation5 + $0x28] sm:$0xff]   ;;  %p1116_p13 = por %p1115_p12, %p1114_p11 }
  0x3e   :  { %873 = vmatprep.subr.bf16.mxu0 %v990_v8  ;;  %v997_v15 = vld [vmem:[#allocation5 + $0x98] sm:$0xff]   ;;  %v1001_v19 = vld [vmem:[#allocation5 + $0xa0] sm:$0xff]   ;;  %v1004_v22 = vld [vmem:[#allocation5 + $0xe8] sm:$0xff]  }
  0x3f   :  { %894 = vmatpush3.bf16.msra.mxu1 %v989_v7  ;;  %v1005_v23 = vld [vmem:[#allocation5 + $0xa8] sm:$0xff]   ;;  %v1006_v24 = vld [vmem:[#allocation5 + $0x70] sm:$0xff]   ;;  %v1010_v28 = vld [vmem:[#allocation5 + $0x78] sm:$0xff]   ;;  %p1117_p0 = pnand %p1116_p13, %p1110_p10 }
  0x40   :  { %895 = vmatprep.subr.bf16.mxu1 %v992_v10  ;;  %v1007_v25 = vld [vmem:[#allocation5 + $0x30] sm:$0xff]   ;;  %v1011_v29 = vld [vmem:[#allocation5 + $0x38] sm:$0xff]   ;;  %v70_v36 = vld [vmem:[#allocation2 + $0x38] sm:$0xff] }
  0x41   :  { %874 = vmatpush3.bf16.msra.mxu0 %v991_v9  ;;  %v1008_v26 = vld [vmem:[#allocation5 + $0xf0] sm:$0xff]   ;;  %v1012_v30 = vld [vmem:[#allocation5 + $0xf8] sm:$0xff]   ;;  %v1014_v38 = vld [vmem:[#allocation5 + $0x140] sm:$0xff]  }
  0x42   :  { %875 = vmatprep.subr.bf16.mxu0 %v994_v12  ;;  %v1009_v27 = vld [vmem:[#allocation5 + $0xb0] sm:$0xff]   ;;  %v64_v31 = vld [vmem:[#allocation2 + $0x8] sm:$0xff]  ;;  %v66_v39 = vld [vmem:[#allocation2 + $0x18] sm:$0xff] }
  0x43   :  { %896 = vmatpush3.bf16.msra.mxu1 %v993_v11  ;;  %v71_v32 = vld [vmem:[#allocation2 + $0x40] sm:$0xff]  ;;  %v1013_v34 = vld [vmem:[#allocation5 + $0xb8] sm:$0xff]   ;;  %v73_v40 = vld [vmem:[#allocation2 + $0x50] sm:$0xff] }
  0x44   :  { %897 = vmatprep.subr.bf16.mxu1 %v996_v14  ;;  %v78_v33 = vpack.c.bf16 %v71_v32, %v64_v31  ;;  %v63_v35 = vld [vmem:[#allocation2] sm:$0xff]  ;;  %v80_v41 = vpack.c.bf16 %v73_v40, %v66_v39  ;;  %v1015_v42 = vld [vmem:[#allocation5 + $0x100] sm:$0xff]   ;;  %v72_v45 = vld [vmem:[#allocation2 + $0x48] sm:$0xff] }
  0x45   :  { %876 = vmatpush3.bf16.msra.mxu0 %v995_v13  ;;  %v77_v37 = vpack.c.bf16 %v70_v36, %v63_v35  ;;  %v65_v44 = vld [vmem:[#allocation2 + $0x10] sm:$0xff]  ;;  %v1016_v47 = vld [vmem:[#allocation5 + $0x148] sm:$0xff]   ;;  %v1018_v49 = vld [vmem:[#allocation5 + $0x150] sm:$0xff]  }
  0x46   :  { %877 = vmatprep.subr.bf16.mxu0 %v998_v16  ;;  %519 = vmatprep.mubr.bf16.mxu0 %v78_v33  ;;  %v79_v46 = vpack.c.bf16 %v72_v45, %v65_v44  ;;  %v1017_v48 = vld [vmem:[#allocation5 + $0x108] sm:$0xff]   ;;  %v1019_v50 = vld [vmem:[#allocation5 + $0x110] sm:$0xff]   ;;  %v1020_v51 = vld [vmem:[#allocation5 + $0x158] sm:$0xff]  }
  0x47   :  { %898 = vmatpush3.bf16.msra.mxu1 %v997_v15  ;;  %560 = vmatprep.mubr.bf16.mxu1 %v80_v41  ;;  %v1021_v52 = vld [vmem:[#allocation5 + $0x118] sm:$0xff]   ;;  %v1022_v53 = vld [vmem:[#allocation5 + $0x160] sm:$0xff]   ;;  %v1024_v55 = vld [vmem:[#allocation5 + $0x168] sm:$0xff]  }
  0x48   :  { %899 = vmatprep.subr.bf16.mxu1 %v1000_v18  ;;  %v1023_v54 = vld [vmem:[#allocation5 + $0x120] sm:$0xff]   ;;  %v68_v57 = vld [vmem:[#allocation2 + $0x28] sm:$0xff]  ;;  %v1025_v58 = vld [vmem:[#allocation5 + $0x128] sm:$0xff]  }
  0x49   :  { %878 = vmatpush3.bf16.msra.mxu0 %v999_v17  ;;  %v1030_v56 = vld [vmem:[#allocation5 + $0x180] sm:$0xff]   ;;  %v1026_v59 = vld [vmem:[#allocation5 + $0x170] sm:$0xff]   ;;  %v76_v63 = vld [vmem:[#allocation2 + $0x68] sm:$0xff] }
  0x4a   :  { %879 = vmatprep.subr.bf16.mxu0 %v1002_v20  ;;  %v75_v60 = vld [vmem:[#allocation2 + $0x60] sm:$0xff]  ;;  %v69_v62 = vld [vmem:[#allocation2 + $0x30] sm:$0xff]  ;;  %v1028_v2 = vld [vmem:[#allocation5 + $0x178] sm:$0xff]  }
  0x4b   :  { %900 = vmatpush3.bf16.msra.mxu1 %v1001_v19  ;;  %v82_v61 = vpack.c.bf16 %v75_v60, %v68_v57  ;;  %v83_v0 = vpack.c.bf16 %v76_v63, %v69_v62  ;;  %v1027_v1 = vld [vmem:[#allocation5 + $0x130] sm:$0xff]   ;;  %v1029_v3 = vld [vmem:[#allocation5 + $0x138] sm:$0xff]   ;;  %v74_v5 = vld [vmem:[#allocation2 + $0x58] sm:$0xff] }
  0x4c   :  { %901 = vmatprep.subr.bf16.mxu1 %v1004_v22  ;;  %v67_v4 = vld [vmem:[#allocation2 + $0x20] sm:$0xff]  ;;  %v1031_v7 = vld [vmem:[#allocation7] sm:$0xff]   ;;  %v1033_v9 = vld [vmem:[#allocation7 + $0x10] sm:$0xff]  }
  0x4d   :  { %880 = vmatpush3.bf16.msra.mxu0 %v1003_v21  ;;  %v81_v6 = vpack.c.bf16 %v74_v5, %v67_v4  ;;  %v1032_v8 = vld [vmem:[#allocation7 + $0x8] sm:$0xff]   ;;  %v1034_v10 = vld [vmem:[#allocation7 + $0x18] sm:$0xff]   ;;  %v1035_v11 = vld [vmem:[#allocation7 + $0x20] sm:$0xff]  }
  0x4e   :  { %881 = vmatprep.subr.bf16.mxu0 %v1006_v24  ;;  %v1036_v12 = vld [vmem:[#allocation7 + $0x28] sm:$0xff]   ;;  %v1037_v13 = vld [vmem:[#allocation7 + $0x30] sm:$0xff]   ;;  %v1038_v14 = vld [vmem:[#allocation7 + $0x38] sm:$0xff]  }
  0x4f   :  { %902 = vmatpush3.bf16.msra.mxu1 %v1005_v23  ;;  %v800_v16 = vld [vmem:[%s1255_s2] ss:$0 sm:$0xff] }
  0x50   :  { %903 = vmatprep.subr.bf16.mxu1 %v1008_v26 }
  0x51   :  { %882 = vmatpush3.bf16.msra.mxu0 %v1007_v25 }
  0x52   :  { %883 = vmatprep.subr.bf16.mxu0 %v1010_v28 }
  0x53   :  { %904 = vmatpush3.bf16.msra.mxu1 %v1009_v27 }
  0x54   :  { %905 = vmatprep.subr.bf16.mxu1 %v1012_v30 }
  0x55   :  { %884 = vmatpush3.bf16.msra.mxu0 %v1011_v29 }
  0x56   :  { %913 = vmatprep.subr.bf16.mxu0 %v1014_v38 }
  0x57   :  { %906 = vmatpush3.bf16.msra.mxu1 %v1013_v34 }
  0x58   :  { %946 = vmatprep.subr.bf16.mxu1 %v1144_v43  ;;  %520 = vmatmul.mubr.bf16.vlgmr.msra.gmra.mrb[0].mxu0 %v77_v37 }
  0x59   :  { %914 = vmatpush3.bf16.msra.mxu0 %v1015_v42  ;;  %601 = vmatprep.mubr.bf16.mxu0 %v82_v61 }
  0x5a   :  { %561 = vmatmul.mubr.bf16.vlgmr.msra.gmra.mrb[0].mxu1 %v79_v46  ;;  %915 = vmatprep.subr.bf16.mxu0 %v1016_v47 }
  0x5b   :  { %948 = vmatprep.mubr.msk.bf16.mxu1 %vm1145_vm0, %v1144_v43  ;;  %947 = vmatpush3.bf16.msra.mxu1 %v1030_v56 }
  0x5c   :  { %952 = vmatprep.subr.bf16.mxu1 %v1144_v43 }
  0x5d   :  { %916 = vmatpush3.bf16.msra.mxu0 %v1017_v48 }
  0x5e   :  { %917 = vmatprep.subr.bf16.mxu0 %v1018_v49 }
  0x61   :  { %918 = vmatpush3.bf16.msra.mxu0 %v1019_v50 }
  0x62   :  { %919 = vmatprep.subr.bf16.mxu0 %v1020_v51  ;;  %949 = vmatmul.mubr.msk.bf16.vlgmr.msra.gmra.mrb[4].mxu1 %vm483_vm1, %v83_v0 }
  0x63   :  { %968 = vmatprep.mubr.msk.bf16.mxu1 %vm1145_vm0, %v1144_v43  ;;  %953 = vmatpush3.bf16.msra.mxu1 %v1031_v7 }
  0x64   :  { %954 = vmatprep.subr.bf16.mxu1 %v1144_v43 }
  0x65   :  { %920 = vmatpush3.bf16.msra.mxu0 %v1021_v52 }
  0x66   :  { %921 = vmatprep.subr.bf16.mxu0 %v1022_v53 }
  0x67   :  { %955 = vmatpush3.bf16.msra.mxu1 %v1032_v8 }
  0x68   :  { %956 = vmatprep.subr.bf16.mxu1 %v1144_v43 }
  0x69   :  { %922 = vmatpush3.bf16.msra.mxu0 %v1023_v54 }
  0x6a   :  { %923 = vmatprep.subr.bf16.mxu0 %v1024_v55  ;;  %v851_v55 = vld [vmem:[%s1257_s4] ss:$0 sm:$0xff] }
  0x6b   :  { %957 = vmatpush3.bf16.msra.mxu1 %v1033_v9 }
  0x6c   :  { %958 = vmatprep.subr.bf16.mxu1 %v1144_v43 }
  0x6d   :  { %924 = vmatpush3.bf16.msra.mxu0 %v1025_v58 }
  0x6e   :  { %925 = vmatprep.subr.bf16.mxu0 %v1026_v59 }
  0x6f   :  { %959 = vmatpush3.bf16.msra.mxu1 %v1034_v10 }
  0x70   :  { %960 = vmatprep.subr.bf16.mxu1 %v1144_v43 }
  0x71   :  { %926 = vmatpush3.bf16.msra.mxu0 %v1027_v1 }
  0x72   :  { %927 = vmatprep.subr.bf16.mxu0 %v1028_v2 }
  0x73   :  { %961 = vmatpush3.bf16.msra.mxu1 %v1035_v11 }
  0x74   :  { %962 = vmatprep.subr.bf16.mxu1 %v1144_v43 }
  0x75   :  { %928 = vmatpush3.bf16.msra.mxu0 %v1029_v3 }
  0x77   :  { %963 = vmatpush3.bf16.msra.mxu1 %v1036_v12 }
  0x78   :  { %602 = vmatmul.mubr.bf16.vlgmr.msra.gmra.mrb[4].mxu0 %v81_v6  ;;  %964 = vmatprep.subr.bf16.mxu1 %v1144_v43 }
  0x7b   :  { %965 = vmatpush3.bf16.msra.mxu1 %v1037_v13 }
  0x7c   :  { %966 = vmatprep.subr.bf16.mxu1 %v1144_v43 }
  0x7f   :  { %967 = vmatpush3.bf16.msra.mxu1 %v1038_v14 }
 0x12b   :  { %v885_v15 = vpop.f32.mrb[0].mxu0 }
 0x12c   :  { %v886_v17 = vpop.f32.mrb[1].mxu0 }
 0x12d   :  { %v887_v18 = vadd.f32 %v886_v17, %v885_v15  ;;  %v888_v19 = vpop.f32.mrb[2].mxu0  ;;  %v907_v20 = vpop.f32.mrb[0].mxu1 }
 0x12e   :  { %v889_v21 = vpop.f32.mrb[3].mxu0  ;;  %v908_v24 = vpop.f32.mrb[1].mxu1 }
 0x12f   :  { %v522_v22 = vadd.f32 %v887_v18, %v800_v16  ;;  %v890_v23 = vadd.f32 %v889_v21, %v888_v19  ;;  %v909_v25 = vadd.f32 %v908_v24, %v907_v20  ;;  %v910_v26 = vpop.f32.mrb[2].mxu1 }
 0x130   :  { %v911_v28 = vpop.f32.mrb[3].mxu1 }
 0x131   :  { %v525_v27 = vadd.f32 %v890_v23, %v800_v16  ;;  %v563_v29 = vadd.f32 %v909_v25, %v522_v22  ;;  %v912_v30 = vadd.f32 %v911_v28, %v910_v26 }
 0x133   :  { %v566_v31 = vadd.f32 %v912_v30, %v525_v27 }
 0x135   :  { %v644_v32 = vpop.f32.mrb[4].mxu1 }
 0x136   :  { %v950_v33 = vpop.f32.mrb[5].mxu1 }
 0x137   :  { %v647_v34 = vpop.f32.mrb[6].mxu1 }
 0x138   :  { %v951_v35 = vpop.f32.mrb[7].mxu1 }
 0x14b   :  { %v929_v36 = vpop.f32.mrb[4].mxu0 }
 0x14c   :  { %v930_v37 = vpop.f32.mrb[5].mxu0 }
 0x14d   :  { %v931_v38 = vadd.f32 %v930_v37, %v929_v36  ;;  %v932_v39 = vpop.f32.mrb[6].mxu0 }
 0x14e   :  { %v933_v40 = vpop.f32.mrb[7].mxu0 }
 0x14f   :  { %v604_v41 = vadd.f32 %v931_v38, %v563_v29  ;;  %v934_v42 = vadd.f32 %v933_v40, %v932_v39 }
 0x151   :  { %v645_v43 = vadd.f32 %v644_v32, %v604_v41  ;;  %v607_v44 = vadd.f32 %v934_v42, %v566_v31 }
 0x153   :  { %v651_v45 = vmul.f32 0.5, %v645_v43  ;;  %v648_v46 = vadd.f32 %v647_v34, %v607_v44 }
 0x155   :  { %1039 = vtanh.f32 %v651_v45  ;;  %v652_v47 = vmul.f32 0.5, %v648_v46 }
 0x157   :  { %1041 = vtanh.f32 %v652_v47 }
 0x15f   :  { %v1040_v48 = vpop.eup %1039 }
 0x160   :  { %v655_v49 = vadd.f32 1.0, %v1040_v48 }
 0x161   :  { %v1042_v50 = vpop.eup %1041 }
 0x162   :  { %v656_v51 = vadd.f32 1.0, %v1042_v50  ;;  %v657_v52 = vmul.f32 0.5, %v655_v49 }
 0x164   :  { %v658_v53 = vmul.f32 0.5, %v656_v51 }
 0x166   :  { %v659_v54 = vpack.c.bf16 %v658_v53, %v657_v52 }
 0x168   :  { %969 = vmatmul.mubr.bf16.vlgmr.msra.gmra.mrb[8].mxu1 %v659_v54 }
 0x23b   :  { %v765_v56 = vpop.f32.mrb[8].mxu1 }
 0x23c   :  { %v970_v57 = vpop.f32.mrb[9].mxu1  ;;  %v766_v59 = vadd.f32 %v851_v55, %v765_v56 }
 0x23d   :  { %v768_v58 = vpop.f32.mrb[10].mxu1 }
 0x23e   :  { %v769_v60 = vadd.f32 %v851_v55, %v768_v58  ;;  %v971_v61 = vpop.f32.mrb[11].mxu1 }
 0x240   :  { %v867_v62 = vpack.c.bf16 %v769_v60, %v766_v59 }
 0x242   :  { %868 = vst [vmem:[#allocation8] sm:$0xff] %v867_v62  }
 0x243   :  { %1120 = shalt.err (!%p1117_p0)
}
 0x244   :  { %s1121_s14 = scalar_lea.hbm %s1258_s5, 128 }
 0x245   :  { %p1122_p1 = scmp.ne.s32.totalorder %s1258_s5, %s1121_s14  ;;  %p1125_p2 = scmp.lt.u32.totalorder %s1121_s14, %s1258_s5 }
 0x247   :  { %p1127_p3 = pnand %p1125_p2, %p1122_p1 }
 0x249   :  { %1130 = shalt.err (!%p1127_p3)
}
 0x24a   :  { %793 = dma.vmem_to_hbm [thread:$0]  %s788_s11, 128, %s1258_s5, [#allocation4], %s1138_s28, %s1138_s28, %s1139_s29  }
 0x24b   :  { %1135 = dma.done.wait [#allocation4], 128  }
 0x24c   :  { %1136 = vsyncadd [#allocation4], 4294967168 }
 0x24d   :  { %797 = vsyncpa [#allocation3], 1 }
 0x24e   :  { %798 = vsyncpa [#allocation6], 1 }
 0x24f   :  { %799 = vsyncpa [#allocation4], 1 }

</bundles_post_ra>
